<compile_context>
chip_gen: v6e
topology: v6e:2x2x1
jax: 0.10.0
libtpu: 0.0.40
codegen_flags: <defaults>
</compile_context>

<pallas_src>
import functools

import jax
import jax.numpy as jnp
from jax.experimental import pallas as pl
from jax.experimental.pallas import tpu as pltpu


# ----------------------------------------------------------------------------
# Per-generation knobs.
# ----------------------------------------------------------------------------
def _tn_cap():
    try:
        kind = jax.devices()[0].device_kind.lower()
    except Exception:
        return 128
    # 256x256 MXU on v6e/v7x; 128-wide on v5e (and older).
    return 256 if ("v6" in kind or "v7" in kind) else 128


def _vmem_limit_bytes():
    cap = 64 * 1024 * 1024
    try:
        cap = pltpu.get_tpu_info().vmem_capacity_bytes
    except Exception:
        pass
    # <= 48 MiB: safe on v7x (64 MiB/TC) and leaves headroom on v5e/v6e.
    return int(min(cap // 2, 48 * 1024 * 1024))


_TN_CAP = _tn_cap()
_VMEM_LIMIT = _vmem_limit_bytes()


def _round_up(x, m):
    return (x + m - 1) // m * m


# ----------------------------------------------------------------------------
# Pallas kernel: tiled (X @ W) with f32 accumulator; scale/bias + activation
# epilogue applied only on the last K step.
# ----------------------------------------------------------------------------
def _fused_matmul_kernel(x_ref, w_ref, s_ref, b_ref, o_ref, acc_ref, *,
                         activation):
    @pl.when(pl.program_id(2) == 0)
    def _():
        acc_ref[...] = jnp.zeros_like(acc_ref)

    acc_ref[...] += jnp.dot(x_ref[...], w_ref[...],
                            preferred_element_type=jnp.float32)

    @pl.when(pl.program_id(2) == pl.num_programs(2) - 1)
    def _():
        y = acc_ref[...] * s_ref[...] + b_ref[...]
        if activation == "relu":
            y = jnp.maximum(y, 0.0)
        elif activation == "sigmoid":
            y = 1.0 / (1.0 + jnp.exp(-y))
        o_ref[...] = y.astype(o_ref.dtype)


@functools.lru_cache(maxsize=None)
def _build_fused_matmul(M, K, N, activation, out_dtype_name):
    out_dtype = jnp.dtype(out_dtype_name)

    # Tiles: multiples of 16 (bf16 sublane packing) / 128 (lanes).
    tm = min(256, _round_up(M, 16))
    tn = min(_TN_CAP, _round_up(N, 128))
    tk = min(512, _round_up(K, 128))
    Mp, Np, Kp = _round_up(M, tm), _round_up(N, tn), _round_up(K, tk)
    grid = (Mp // tm, Np // tn, Kp // tk)

    kernel = functools.partial(_fused_matmul_kernel, activation=activation)
    call = pl.pallas_call(
        kernel,
        out_shape=jax.ShapeDtypeStruct((Mp, Np), out_dtype),
        grid=grid,
        in_specs=[
            pl.BlockSpec((tm, tk), lambda i, j, k: (i, k)),
            pl.BlockSpec((tk, tn), lambda i, j, k: (k, j)),
            pl.BlockSpec((1, tn), lambda i, j, k: (0, j)),
            pl.BlockSpec((1, tn), lambda i, j, k: (0, j)),
        ],
        out_specs=pl.BlockSpec((tm, tn), lambda i, j, k: (i, j)),
        scratch_shapes=[pltpu.VMEM((tm, tn), jnp.float32)],
        compiler_params=pltpu.CompilerParams(
            dimension_semantics=("parallel", "parallel", "arbitrary"),
            vmem_limit_bytes=_VMEM_LIMIT),
    )

    def run(x, w, scale, bias):
        x = x.astype(jnp.bfloat16)
        w = w.astype(jnp.bfloat16)
        scale = scale.astype(jnp.float32).reshape(1, N)
        bias = bias.astype(jnp.float32).reshape(1, N)
        if (Mp, Kp) != (M, K):
            x = jnp.pad(x, ((0, Mp - M), (0, Kp - K)))
        if (Kp, Np) != (K, N):
            w = jnp.pad(w, ((0, Kp - K), (0, Np - N)))
        if Np != N:
            scale = jnp.pad(scale, ((0, 0), (0, Np - N)))
            bias = jnp.pad(bias, ((0, 0), (0, Np - N)))
        out = call(x, w, scale, bias)
        return out[:M, :N]

    return jax.jit(run)


def fused_matmul(x, w, scale, bias, activation="none",
                 out_dtype=jnp.bfloat16):
    M, K = x.shape
    K2, N = w.shape
    assert K == K2
    fn = _build_fused_matmul(M, K, N, activation, jnp.dtype(out_dtype).name)
    return fn(x, w, scale, bias)


# ----------------------------------------------------------------------------
# Conv / pooling glue (NHWC).
# ----------------------------------------------------------------------------
def _im2col(x_nhwc, k, stride, pad):
    # NOTE: per the perf review the k*k taps could be folded into the kernel's
    # reduction grid axis to avoid materializing im2col in HBM; kept as glue
    # since ResNet-50's FLOPs are dominated by 1x1 convs that bypass im2col.
    n, h, w, c = x_nhwc.shape
    xp = jnp.pad(x_nhwc, ((0, 0), (pad, pad), (pad, pad), (0, 0)))
    ho = (h + 2 * pad - k) // stride + 1
    wo = (w + 2 * pad - k) // stride + 1
    cols = []
    for ky in range(k):
        for kx in range(k):
            cols.append(xp[:, ky:ky + (ho - 1) * stride + 1:stride,
                           kx:kx + (wo - 1) * stride + 1:stride, :])
    patches = jnp.concatenate(cols, axis=-1)          # [n, ho, wo, k*k*c]
    return patches.reshape(n * ho * wo, k * k * c), (n, ho, wo)


def conv_bn_act(x_nhwc, p, activation):
    cout = p["w"].shape[1]
    if p["ksize"] == 1:
        s = p["stride"]
        if s > 1:
            x_nhwc = x_nhwc[:, ::s, ::s, :]
        n, h, w_, c = x_nhwc.shape
        y = fused_matmul(x_nhwc.reshape(n * h * w_, c), p["w"],
                         p["scale"], p["bias"], activation)
        return y.reshape(n, h, w_, cout)
    patches, (n, ho, wo) = _im2col(x_nhwc, p["ksize"], p["stride"], p["pad"])
    y = fused_matmul(patches, p["w"], p["scale"], p["bias"], activation)
    return y.reshape(n, ho, wo, cout)


def _maxpool_3x3_s2(x):
    init = jnp.asarray(-jnp.inf, x.dtype)
    return jax.lax.reduce_window(
        x, init, jax.lax.max,
        window_dimensions=(1, 3, 3, 1),
        window_strides=(1, 2, 2, 1),
        padding=((0, 0), (1, 1), (1, 1), (0, 0)))


# ----------------------------------------------------------------------------
# Parameter init (eval-mode BatchNorm folded into per-channel scale/bias).
# ----------------------------------------------------------------------------
def _folded_bn_params(key, cout):
    kg, kb, km, kv = jax.random.split(key, 4)
    gamma = jax.random.uniform(kg, (cout,), jnp.float32, 0.5, 1.5)
    beta = 0.1 * jax.random.normal(kb, (cout,), jnp.float32)
    mean = 0.1 * jax.random.normal(km, (cout,), jnp.float32)
    var = jax.random.uniform(kv, (cout,), jnp.float32, 0.5, 1.5)
    scale = gamma * jax.lax.rsqrt(var + 1e-5)
    bias = beta - mean * scale
    return scale.reshape(1, cout), bias.reshape(1, cout)


def _conv_bn_params(key, cin, cout, ksize, stride, pad):
    kw, kbn = jax.random.split(key)
    fan_in = ksize * ksize * cin
    w = jax.random.normal(kw, (ksize, ksize, cin, cout), jnp.float32)
    w = w * jnp.sqrt(2.0 / fan_in)
    scale, bias = _folded_bn_params(kbn, cout)
    # (ky, kx, cin) flattening matches the im2col concat order above.
    return dict(w=w.reshape(ksize * ksize * cin, cout).astype(jnp.bfloat16),
                scale=scale, bias=bias, ksize=ksize, stride=stride, pad=pad)


def _linear_params(key, fin, fout):
    kw, kb = jax.random.split(key)
    w = jax.random.normal(kw, (fin, fout), jnp.float32) * jnp.sqrt(1.0 / fin)
    b = 0.01 * jax.random.normal(kb, (fout,), jnp.float32)
    return dict(w=w.astype(jnp.bfloat16),
                scale=jnp.ones((1, fout), jnp.float32),
                bias=b.reshape(1, fout).astype(jnp.float32))


def _bottleneck_params(key, inplanes, planes, stride):
    k1, k2, k3, k4 = jax.random.split(key, 4)
    p = dict(conv1=_conv_bn_params(k1, inplanes, planes, 1, 1, 0),
             conv2=_conv_bn_params(k2, planes, planes, 3, stride, 1),
             conv3=_conv_bn_params(k3, planes, planes * 4, 1, 1, 0),
             downsample=None)
    if stride != 1 or inplanes != planes * 4:
        p["downsample"] = _conv_bn_params(k4, inplanes, planes * 4, 1, stride, 0)
    return p


def init_params(key, in_channels=3, pred_dim=1):
    key, kstem = jax.random.split(key)
    backbone = dict(conv1=_conv_bn_params(kstem, in_channels, 64, 7, 2, 3))
    inplanes, layers = 64, []
    for planes, blocks, stride in [(64, 3, 1), (128, 4, 2),
                                   (256, 6, 2), (512, 3, 2)]:
        blk_params = []
        for b in range(blocks):
            key, kb = jax.random.split(key)
            s = stride if b == 0 else 1
            blk_params.append(_bottleneck_params(kb, inplanes, planes, s))
            inplanes = planes * 4
        layers.append(blk_params)
    backbone["layers"] = layers
    key, kfc = jax.random.split(key)
    backbone["fc"] = _linear_params(kfc, 2048, 1000)

    key, k1, k2, k3 = jax.random.split(key, 4)
    head = dict(fc1=_linear_params(k1, 1000, 512),
                fc2=_linear_params(k2, 512, 128),
                fc3=_linear_params(k3, 128, pred_dim))
    return dict(backbone=backbone, head=head)


# ----------------------------------------------------------------------------
# Forward pass.
# ----------------------------------------------------------------------------
def _linear(x, p, activation, out_dtype=jnp.bfloat16):
    return fused_matmul(x, p["w"], p["scale"], p["bias"], activation, out_dtype)


def _bottleneck_forward(x, p):
    identity = x
    out = conv_bn_act(x, p["conv1"], "relu")
    out = conv_bn_act(out, p["conv2"], "relu")
    out = conv_bn_act(out, p["conv3"], "none")
    if p["downsample"] is not None:
        identity = conv_bn_act(x, p["downsample"], "none")
    return jnp.maximum(out + identity, 0).astype(jnp.bfloat16)


def resnet50_forward(x_nchw, bp):
    x = jnp.transpose(x_nchw, (0, 2, 3, 1)).astype(jnp.bfloat16)  # NCHW->NHWC
    x = conv_bn_act(x, bp["conv1"], "relu")
    x = _maxpool_3x3_s2(x)
    for layer in bp["layers"]:
        for blk in layer:
            x = _bottleneck_forward(x, blk)
    x = jnp.mean(x.astype(jnp.float32), axis=(1, 2))   # adaptive avgpool (1,1)
    return _linear(x.astype(jnp.bfloat16), bp["fc"], "none")       # (N, 1000)


def resnet50cls_forward(x_nchw, params):
    feats = resnet50_forward(x_nchw, params["backbone"])
    x = feats                                  # Dropout: identity in eval mode.
    x = _linear(x, params["head"]["fc1"], "relu")
    x = _linear(x, params["head"]["fc2"], "relu")
    x = _linear(x, params["head"]["fc3"], "sigmoid", out_dtype=jnp.float32)
    return x


if __name__ == "__main__":
    key = jax.random.PRNGKey(0)
    kx, kp = jax.random.split(key)

    n, c, h, w = 2, 3, 32, 32          # small NCHW input
    pred_dim = 1                       # c.discriminator_pred_dim undefined; use 1

    x = jax.random.normal(kx, (n, c, h, w), jnp.float32)
    params = init_params(kp, in_channels=c, pred_dim=pred_dim)

    out = resnet50cls_forward(x, params)
    out = jax.block_until_ready(out)

    assert out.shape == (n, pred_dim)
    assert bool(jnp.all(jnp.isfinite(out)))
    assert bool(jnp.all((out >= 0.0) & (out <= 1.0)))
    print("KERNEL_OK")
</pallas_src>

<mosaic_0001>
module attributes {stable_mosaic.version = 11 : i64} {
  func.func @_fused_matmul_kernel(%arg0: i32, %arg1: i32, %arg2: i32, %arg3: memref<256x256xbf16, #tpu.memory_space<vmem>>, %arg4: memref<256x128xbf16, #tpu.memory_space<vmem>>, %arg5: memref<1x128xf32, #tpu.memory_space<vmem>>, %arg6: memref<1x128xf32, #tpu.memory_space<vmem>>, %arg7: memref<256x128xbf16, #tpu.memory_space<vmem>>, %arg8: memref<256x128xf32, #tpu.memory_space<vmem>>) attributes {dimension_semantics = [#tpu.dimension_semantics<parallel>, #tpu.dimension_semantics<parallel>, #tpu.dimension_semantics<arbitrary>], iteration_bounds = array<i64: 2, 1, 1>, scalar_prefetch = 0 : i64, scratch_operands = 1 : i64, tpu.core_type = #tpu.core_type<tc>, window_params = [{transform_indices = @transform_0, window_bounds = array<i64: 256, 256>}, {transform_indices = @transform_1, window_bounds = array<i64: 256, 128>}, {transform_indices = @transform_2, window_bounds = array<i64: 1, 128>}, {transform_indices = @transform_3, window_bounds = array<i64: 1, 128>}, {transform_indices = @transform_4, window_bounds = array<i64: 256, 128>}]} {
    %c0_i32 = arith.constant 0 : i32
    %0 = arith.cmpi eq, %arg2, %c0_i32 : i32
    %1 = arith.extui %0 : i1 to i32
    %c0_i32_0 = arith.constant 0 : i32
    %2 = arith.cmpi ne, %1, %c0_i32_0 : i32
    scf.if %2 {
      %cst_10 = arith.constant 0.000000e+00 : f32
      %12 = vector.broadcast %cst_10 : f32 to vector<256x128xf32>
      %c0_11 = arith.constant 0 : index
      %c0_12 = arith.constant 0 : index
      %13 = vector.load %arg8[%c0_11, %c0_12] : memref<256x128xf32, #tpu.memory_space<vmem>>, vector<256x128xf32>
      tpu.vector_store %arg8[%c0_11, %c0_12], %12 {strides = array<i32>} : memref<256x128xf32, #tpu.memory_space<vmem>>, vector<256x128xf32>,
    } else {
    }
    %c0 = arith.constant 0 : index
    %c0_1 = arith.constant 0 : index
    %3 = vector.load %arg8[%c0, %c0_1] : memref<256x128xf32, #tpu.memory_space<vmem>>, vector<256x128xf32>
    %c0_2 = arith.constant 0 : index
    %c0_3 = arith.constant 0 : index
    %4 = vector.load %arg3[%c0_2, %c0_3] : memref<256x256xbf16, #tpu.memory_space<vmem>>, vector<256x256xbf16>
    %c0_4 = arith.constant 0 : index
    %c0_5 = arith.constant 0 : index
    %5 = vector.load %arg4[%c0_4, %c0_5] : memref<256x128xbf16, #tpu.memory_space<vmem>>, vector<256x128xbf16>
    %cst = arith.constant dense<0.000000e+00> : vector<256x128xf32>
    %6 = tpu.matmul %4, %5, %cst {dimension_numbers = #tpu.dot_dimension_numbers<[1], [0], [0], [1], [0, 0, 1, 1], [], []>} : vector<256x256xbf16>, vector<256x128xbf16>, vector<256x128xf32> -> vector<256x128xf32>
    %7 = arith.addf %3, %6 : vector<256x128xf32>
    %c0_6 = arith.constant 0 : index
    %c0_7 = arith.constant 0 : index
    %8 = vector.load %arg8[%c0_6, %c0_7] : memref<256x128xf32, #tpu.memory_space<vmem>>, vector<256x128xf32>
    tpu.vector_store %arg8[%c0_6, %c0_7], %7 {strides = array<i32>} : memref<256x128xf32, #tpu.memory_space<vmem>>, vector<256x128xf32>,
    %c0_i32_8 = arith.constant 0 : i32
    %9 = arith.cmpi eq, %arg2, %c0_i32_8 : i32
    %10 = arith.extui %9 : i1 to i32
    %c0_i32_9 = arith.constant 0 : i32
    %11 = arith.cmpi ne, %10, %c0_i32_9 : i32
    scf.if %11 {
      %c0_10 = arith.constant 0 : index
      %c0_11 = arith.constant 0 : index
      %12 = vector.load %arg8[%c0_10, %c0_11] : memref<256x128xf32, #tpu.memory_space<vmem>>, vector<256x128xf32>
      %c0_12 = arith.constant 0 : index
      %c0_13 = arith.constant 0 : index
      %13 = vector.load %arg5[%c0_12, %c0_13] : memref<1x128xf32, #tpu.memory_space<vmem>>, vector<1x128xf32>
      %14 = vector.broadcast %13 : vector<1x128xf32> to vector<256x128xf32>
      %15 = arith.mulf %12, %14 : vector<256x128xf32>
      %c0_14 = arith.constant 0 : index
      %c0_15 = arith.constant 0 : index
      %16 = vector.load %arg6[%c0_14, %c0_15] : memref<1x128xf32, #tpu.memory_space<vmem>>, vector<1x128xf32>
      %17 = vector.broadcast %16 : vector<1x128xf32> to vector<256x128xf32>
      %18 = arith.addf %15, %17 : vector<256x128xf32>
      %cst_16 = arith.constant 0.000000e+00 : f32
      %19 = vector.broadcast %cst_16 : f32 to vector<256x128xf32>
      %20 = arith.maximumf %18, %19 : vector<256x128xf32>
      %21 = arith.truncf %20 : vector<256x128xf32> to vector<256x128xbf16>
      %c0_17 = arith.constant 0 : index
      %c0_18 = arith.constant 0 : index
      %22 = vector.load %arg7[%c0_17, %c0_18] : memref<256x128xbf16, #tpu.memory_space<vmem>>, vector<256x128xbf16>
      tpu.vector_store %arg7[%c0_17, %c0_18], %21 {strides = array<i32>} : memref<256x128xbf16, #tpu.memory_space<vmem>>, vector<256x128xbf16>,
    } else {
    }
    return
  }
  func.func @transform_0(%arg0: i32, %arg1: i32, %arg2: i32) -> (i32, i32) {
    %c0_i32 = arith.constant 0 : i32
    return %arg0, %arg2 : i32, i32
  }
  func.func @transform_1(%arg0: i32, %arg1: i32, %arg2: i32) -> (i32, i32) {
    %c0_i32 = arith.constant 0 : i32
    return %arg2, %arg1 : i32, i32
  }
  func.func @transform_2(%arg0: i32, %arg1: i32, %arg2: i32) -> (i32, i32) {
    %c0_i32 = arith.constant 0 : i32
    %c0_i32_0 = arith.constant 0 : i32
    return %c0_i32, %arg1 : i32, i32
  }
  func.func @transform_3(%arg0: i32, %arg1: i32, %arg2: i32) -> (i32, i32) {
    %c0_i32 = arith.constant 0 : i32
    %c0_i32_0 = arith.constant 0 : i32
    return %c0_i32, %arg1 : i32, i32
  }
  func.func @transform_4(%arg0: i32, %arg1: i32, %arg2: i32) -> (i32, i32) {
    %c0_i32 = arith.constant 0 : i32
    return %arg0, %arg1 : i32, i32
  }
}

</mosaic_0001>

<bundles_post_ra>
// kernel: run.1
= control target key start
LH: loop header
LB: loop body
LE: loop exit
PB: predicated region body
PF: predicated region fallthrough
CT: control target
= control target key end

     0   :  { %s1843_s15 = smov 0   ;;  %s1845_s16 = smov 0   ;;  %s2054_s0 = inlined_call_operand.vmem [shape: bf16[512,256], index: 0, kind: input, shape index: {}]   ;;  %s2055_s1 = inlined_call_operand.vmem [shape: bf16[256,128], index: 1, kind: input, shape index: {}]   ;;  %s2056_s2 = inlined_call_operand.vmem [shape: f32[1,128], index: 2, kind: input, shape index: {}]   ;;  %s2057_s3 = inlined_call_operand.vmem [shape: f32[1,128], index: 3, kind: input, shape index: {}]   ;;  %s2058_s4 = inlined_call_operand.vmem [shape: bf16[512,128], index: 4, kind: output, shape index: {}]  }
   0x1   :  { %s1847_s17 = smov 0  }
   0x2 LB: > { %s33_s18 = sadd.s32 1, %s1812_s16  ;;  %p1360_p0 = scmp.ge.s32.totalorder %s1816_s17, 1  ;;  %s1816_s17 = sphi %s1847_s17, %s14_s17   ;;  %s1812_s16 = sphi %s1845_s16, %s2060_s16   ;;  %s1808_s15 = sphi %s1843_s15, %s2059_s15  }
   0x3   : > { %p35_p1 = scmp.ge.s32.totalorder %s33_s18, 2  ;;  %p224_p2 = scmp.lt.s32.totalorder %s1816_s17, 3 }
   0x5   : > { %s2062_s18 = smov (%p35_p1, %s33_s18), 0  ;;  %p225_p3 = pnand %p1360_p0, %p224_p2 }
   0x6   : > { %s1361_s21 = sshll.u32 (!%p225_p3), %s1808_s15, 5 }
   0x7   : > { %228 = sbr.rel (%p225_p3) target bundleno = 311 (0x137), region = 36  ;;  %p274_p4 = scmp.lt.s32.totalorder (!%p225_p3), %s1361_s21, 63 }
   0xc   : > { %v1730_v0 = vld [vmem:[%s2055_s1 + $0x78] sm:$0xff]   ;;  %v1732_v2 = vld [vmem:[%s2055_s1 + $0x70] sm:$0xff]   ;;  %v1734_v4 = vld [vmem:[%s2055_s1 + $0x68] sm:$0xff]   ;;  %s2064_s21 = smov (!%p274_p4, %s1361_s21), 63 }
   0xd   : > { %v1731_v1 = vld [vmem:[%s2055_s1 + $0x38] sm:$0xff]   ;;  %1578 = vmatprep.subr.bf16.mxu0 %v1730_v0  ;;  %1690 = vmatprep.subr.bf16.mxu1 %v1730_v0  ;;  %v1733_v3 = vld [vmem:[%s2055_s1 + $0x30] sm:$0xff]   ;;  %v1735_v5 = vld [vmem:[%s2055_s1 + $0x28] sm:$0xff]   ;;  %s1450_s10 = sshll.u32 %s2064_s21, 3  ;;  %s1365_s12 = sshll.u32 %s2064_s21, 2 }
   0xe   : > { %1579 = vmatpush3.bf16.msra.mxu0 %v1731_v1  ;;  %1698 = vmatpush3.bf16.msra.mxu1 %v1731_v1  ;;  %v1736_v6 = vld [vmem:[%s2055_s1 + $0x60] sm:$0xff]   ;;  %v1738_v8 = vld [vmem:[%s2055_s1 + $0x58] sm:$0xff]   ;;  %s1894_s15 = scalar_lea.vmem %s2054_s0, %s1450_s10  ;;  %v1740_v10 = vld [vmem:[%s2055_s1 + $0x50] sm:$0xff]  }
   0xf   : > { %1580 = vmatprep.subr.bf16.mxu0 %v1732_v2  ;;  %1691 = vmatprep.subr.bf16.mxu1 %v1732_v2  ;;  %v1737_v7 = vld [vmem:[%s2055_s1 + $0x20] sm:$0xff]   ;;  %v1739_v9 = vld [vmem:[%s2055_s1 + $0x18] sm:$0xff]   ;;  %v1741_v13 = vld [vmem:[%s2055_s1 + $0x10] sm:$0xff]  }
  0x10   : > { %v1748_v11 = vld [vmem:[%s1894_s15 + $0x4] ss:$8 sps:$4 sm:$0xff]   ;;  %v1746_v18 = vld [vmem:[%s1894_s15] ss:$8 sps:$4 sm:$0xff]   ;;  %v1752_v20 = vld [vmem:[%s1894_s15 + $0x14] ss:$8 sps:$4 sm:$0xff]  }
  0x11   : > { %v1751_v12 = vld [vmem:[%s1894_s15 + $0x84] ss:$8 sps:$4 sm:$0xff]   ;;  %729 = vmatprep.mubr.bf16.mxu0 %v1748_v11  ;;  %v1749_v19 = vld [vmem:[%s1894_s15 + $0x80] ss:$8 sps:$4 sm:$0xff]   ;;  %v1754_v21 = vld [vmem:[%s1894_s15 + $0x94] ss:$8 sps:$4 sm:$0xff]  }
  0x12   : > { %1581 = vmatpush3.bf16.msra.mxu0 %v1733_v3  ;;  %1699 = vmatpush3.bf16.msra.mxu1 %v1733_v3  ;;  %v1742_v14 = vld [vmem:[%s2055_s1 + $0x48] sm:$0xff]   ;;  %v1744_v16 = vld [vmem:[%s2055_s1 + $0x40] sm:$0xff]   ;;  %v1756_v22 = vld [vmem:[%s1894_s15 + $0x10] ss:$8 sps:$4 sm:$0xff]  }
  0x13   : > { %1582 = vmatprep.subr.bf16.mxu0 %v1734_v4  ;;  %1692 = vmatprep.subr.bf16.mxu1 %v1734_v4  ;;  %v1743_v15 = vld [vmem:[%s2055_s1 + $0x8] sm:$0xff]   ;;  %v1745_v17 = vld [vmem:[%s2055_s1] sm:$0xff]   ;;  %v1757_v23 = vld [vmem:[%s1894_s15 + $0x90] ss:$8 sps:$4 sm:$0xff]  }
  0x14   : > { %793 = vmatprep.mubr.bf16.mxu1 %v1751_v12  ;;  %v1758_v24 = vld [vmem:[%s1894_s15 + $0x24] ss:$8 sps:$4 sm:$0xff]   ;;  %v1762_v26 = vld [vmem:[%s1894_s15 + $0x20] ss:$8 sps:$4 sm:$0xff]   ;;  %v1764_v28 = vld [vmem:[%s1894_s15 + $0x34] ss:$8 sps:$4 sm:$0xff]  }
  0x15   : > { %v1760_v25 = vld [vmem:[%s1894_s15 + $0xa4] ss:$8 sps:$4 sm:$0xff]   ;;  %v1763_v27 = vld [vmem:[%s1894_s15 + $0xa0] ss:$8 sps:$4 sm:$0xff]   ;;  %v1766_v29 = vld [vmem:[%s1894_s15 + $0xb4] ss:$8 sps:$4 sm:$0xff]  }
  0x16   : > { %1583 = vmatpush3.bf16.msra.mxu0 %v1735_v5  ;;  %1700 = vmatpush3.bf16.msra.mxu1 %v1735_v5  ;;  %v1768_v30 = vld [vmem:[%s1894_s15 + $0x30] ss:$8 sps:$4 sm:$0xff]   ;;  %v1770_v32 = vld [vmem:[%s1894_s15 + $0x44] ss:$8 sps:$4 sm:$0xff]   ;;  %v1774_v34 = vld [vmem:[%s1894_s15 + $0x40] ss:$8 sps:$4 sm:$0xff]  }
  0x17   : > { %1584 = vmatprep.subr.bf16.mxu0 %v1736_v6  ;;  %1693 = vmatprep.subr.bf16.mxu1 %v1736_v6  ;;  %v1769_v31 = vld [vmem:[%s1894_s15 + $0xb0] ss:$8 sps:$4 sm:$0xff]   ;;  %v1772_v33 = vld [vmem:[%s1894_s15 + $0xc4] ss:$8 sps:$4 sm:$0xff]   ;;  %v1775_v35 = vld [vmem:[%s1894_s15 + $0xc0] ss:$8 sps:$4 sm:$0xff]  }
  0x18   : > { %v1776_v36 = vld [vmem:[%s1894_s15 + $0x54] ss:$8 sps:$4 sm:$0xff]   ;;  %v1780_v38 = vld [vmem:[%s1894_s15 + $0x50] ss:$8 sps:$4 sm:$0xff]   ;;  %v1782_v40 = vld [vmem:[%s1894_s15 + $0x64] ss:$8 sps:$4 sm:$0xff]  }
  0x19   : > { %v1778_v37 = vld [vmem:[%s1894_s15 + $0xd4] ss:$8 sps:$4 sm:$0xff]   ;;  %v1781_v39 = vld [vmem:[%s1894_s15 + $0xd0] ss:$8 sps:$4 sm:$0xff]   ;;  %v1784_v41 = vld [vmem:[%s1894_s15 + $0xe4] ss:$8 sps:$4 sm:$0xff]  }
  0x1a   : > { %1585 = vmatpush3.bf16.msra.mxu0 %v1737_v7  ;;  %1701 = vmatpush3.bf16.msra.mxu1 %v1737_v7  ;;  %v1786_v42 = vld [vmem:[%s1894_s15 + $0x60] ss:$8 sps:$4 sm:$0xff]   ;;  %v1788_v44 = vld [vmem:[%s1894_s15 + $0x74] ss:$8 sps:$4 sm:$0xff]   ;;  %v1792_v46 = vld [vmem:[%s1894_s15 + $0x70] ss:$8 sps:$4 sm:$0xff]  }
  0x1b   : > { %1586 = vmatprep.subr.bf16.mxu0 %v1738_v8  ;;  %1694 = vmatprep.subr.bf16.mxu1 %v1738_v8  ;;  %v1787_v43 = vld [vmem:[%s1894_s15 + $0xe0] ss:$8 sps:$4 sm:$0xff]   ;;  %v1790_v45 = vld [vmem:[%s1894_s15 + $0xf4] ss:$8 sps:$4 sm:$0xff]   ;;  %v1793_v47 = vld [vmem:[%s1894_s15 + $0xf0] ss:$8 sps:$4 sm:$0xff]   ;;  %s1971_s15 = scalar_lea.vmem %s2058_s4, %s1365_s12 }
  0x1c   : > { %v1952_v51 = vld [vmem:[%s2056_s2] ss:$0 sm:$0xff] }
  0x1d   : > { %v1959_v59 = vld [vmem:[%s2057_s3] ss:$0 sm:$0xff] }
  0x1e   : > { %1587 = vmatpush3.bf16.msra.mxu0 %v1739_v9  ;;  %1702 = vmatpush3.bf16.msra.mxu1 %v1739_v9 }
  0x1f   : > { %1588 = vmatprep.subr.bf16.mxu0 %v1740_v10  ;;  %1695 = vmatprep.subr.bf16.mxu1 %v1740_v10 }
  0x22   : > { %1589 = vmatpush3.bf16.msra.mxu0 %v1741_v13  ;;  %1703 = vmatpush3.bf16.msra.mxu1 %v1741_v13 }
  0x23   : > { %1590 = vmatprep.subr.bf16.mxu0 %v1742_v14  ;;  %1696 = vmatprep.subr.bf16.mxu1 %v1742_v14 }
  0x26   : > { %1591 = vmatpush3.bf16.msra.mxu0 %v1743_v15  ;;  %1704 = vmatpush3.bf16.msra.mxu1 %v1743_v15 }
  0x27   : > { %1592 = vmatprep.subr.bf16.mxu0 %v1744_v16  ;;  %1697 = vmatprep.subr.bf16.mxu1 %v1744_v16 }
  0x2a   : > { %1593 = vmatpush3.bf16.msra.mxu0 %v1745_v17  ;;  %1705 = vmatpush3.bf16.msra.mxu1 %v1745_v17 }
  0x2d   : > { %730 = vmatmul.mubr.bf16.vlgmr.msra.gmra.mxu0 %v1746_v18  ;;  %794 = vmatmul.mubr.bf16.vlgmr.msra.gmra.mxu1 %v1749_v19 }
  0x2e   : > { %737 = vmatprep.mubr.bf16.mxu0 %v1752_v20  ;;  %801 = vmatprep.mubr.bf16.mxu1 %v1754_v21 }
  0x35   : > { %738 = vmatmul.mubr.bf16.gmra.mxu0 %v1756_v22  ;;  %802 = vmatmul.mubr.bf16.gmra.mxu1 %v1757_v23 }
  0x36   : > { %745 = vmatprep.mubr.bf16.mxu0 %v1758_v24  ;;  %809 = vmatprep.mubr.bf16.mxu1 %v1760_v25 }
  0x3d   : > { %746 = vmatmul.mubr.bf16.gmra.mxu0 %v1762_v26  ;;  %810 = vmatmul.mubr.bf16.gmra.mxu1 %v1763_v27 }
  0x3e   : > { %753 = vmatprep.mubr.bf16.mxu0 %v1764_v28  ;;  %817 = vmatprep.mubr.bf16.mxu1 %v1766_v29 }
  0x45   : > { %754 = vmatmul.mubr.bf16.gmra.mxu0 %v1768_v30  ;;  %818 = vmatmul.mubr.bf16.gmra.mxu1 %v1769_v31 }
  0x46   : > { %761 = vmatprep.mubr.bf16.mxu0 %v1770_v32  ;;  %825 = vmatprep.mubr.bf16.mxu1 %v1772_v33 }
  0x4d   : > { %762 = vmatmul.mubr.bf16.gmra.mxu0 %v1774_v34  ;;  %826 = vmatmul.mubr.bf16.gmra.mxu1 %v1775_v35 }
  0x4e   : > { %769 = vmatprep.mubr.bf16.mxu0 %v1776_v36  ;;  %833 = vmatprep.mubr.bf16.mxu1 %v1778_v37 }
  0x55   : > { %770 = vmatmul.mubr.bf16.gmra.mxu0 %v1780_v38  ;;  %834 = vmatmul.mubr.bf16.gmra.mxu1 %v1781_v39 }
  0x56   : > { %777 = vmatprep.mubr.bf16.mxu0 %v1782_v40  ;;  %841 = vmatprep.mubr.bf16.mxu1 %v1784_v41 }
  0x5d   : > { %778 = vmatmul.mubr.bf16.gmra.mxu0 %v1786_v42  ;;  %842 = vmatmul.mubr.bf16.gmra.mxu1 %v1787_v43 }
  0x5e   : > { %785 = vmatprep.mubr.bf16.mxu0 %v1788_v44  ;;  %849 = vmatprep.mubr.bf16.mxu1 %v1790_v45 }
  0x65   : > { %786 = vmatmul.mubr.bf16.gmra.mxu0 %v1792_v46  ;;  %850 = vmatmul.mubr.bf16.gmra.mxu1 %v1793_v47 }
  0xed   : > { %v1594_v48 = vpop.f32.mrf.mxu0  ;;  %v1642_v49 = vpop.f32.mrf.mxu1 }
  0xef   : > { %v1595_v50 = vpop.f32.mrf.mxu0  ;;  %v1643_v52 = vpop.f32.mrf.mxu1 }
  0xf0   : > { %v1596_v53 = vadd.f32 %v1595_v50, %v1594_v48  ;;  %v1644_v54 = vadd.f32 %v1643_v52, %v1642_v49 }
  0xf1   : > { %v1597_v55 = vpop.f32.mrf.mxu0  ;;  %v1645_v56 = vpop.f32.mrf.mxu1 }
  0xf2   : > { %v964_v57 = vmul.f32 %v1596_v53, %v1952_v51  ;;  %v980_v58 = vmul.f32 %v1644_v54, %v1952_v51 }
  0xf3   : > { %v1598_v60 = vpop.f32.mrf.mxu0  ;;  %v1646_v61 = vpop.f32.mrf.mxu1 }
  0xf4   : > { %v1599_v62 = vadd.f32 %v1598_v60, %v1597_v55  ;;  %v1647_v63 = vadd.f32 %v1646_v61, %v1645_v56  ;;  %v1003_v2 = vadd.f32 %v1959_v59, %v964_v57  ;;  %v1019_v3 = vadd.f32 %v1959_v59, %v980_v58 }
  0xf5   : > { %v1600_v0 = vpop.f32.mrf.mxu0  ;;  %v1648_v1 = vpop.f32.mrf.mxu1 }
  0xf6   : > { %v965_v4 = vmul.f32 %v1599_v62, %v1952_v51  ;;  %v981_v5 = vmul.f32 %v1647_v63, %v1952_v51  ;;  %v1035_v14 = vmax.f32 %v1003_v2, 0.0  ;;  %v1051_v15 = vmax.f32 %v1019_v3, 0.0 }
  0xf7   : > { %v1601_v6 = vpop.f32.mrf.mxu0  ;;  %v1649_v7 = vpop.f32.mrf.mxu1 }
  0xf8   : > { %v1004_v8 = vadd.f32 %v1959_v59, %v965_v4  ;;  %v1020_v9 = vadd.f32 %v1959_v59, %v981_v5  ;;  %v1602_v10 = vadd.f32 %v1601_v6, %v1600_v0  ;;  %v1650_v11 = vadd.f32 %v1649_v7, %v1648_v1 }
  0xf9   : > { %v1603_v12 = vpop.f32.mrf.mxu0  ;;  %v1651_v13 = vpop.f32.mrf.mxu1 }
  0xfa   : > { %v1036_v16 = vmax.f32 %v1004_v8, 0.0  ;;  %v1052_v17 = vmax.f32 %v1020_v9, 0.0  ;;  %v966_v18 = vmul.f32 %v1602_v10, %v1952_v51  ;;  %v982_v19 = vmul.f32 %v1650_v11, %v1952_v51 }
  0xfb   : > { %v1604_v20 = vpop.f32.mrf.mxu0  ;;  %v1652_v21 = vpop.f32.mrf.mxu1 }
  0xfc   : > { %v1486_v22 = vpack.c.bf16 %v1036_v16, %v1035_v14  ;;  %v1526_v23 = vpack.c.bf16 %v1052_v17, %v1051_v15  ;;  %v1605_v24 = vadd.f32 %v1604_v20, %v1603_v12  ;;  %v1653_v25 = vadd.f32 %v1652_v21, %v1651_v13 }
  0xfd   : > { %v1606_v26 = vpop.f32.mrf.mxu0  ;;  %v1654_v27 = vpop.f32.mrf.mxu1  ;;  %v1005_v28 = vadd.f32 %v1959_v59, %v966_v18  ;;  %v1021_v29 = vadd.f32 %v1959_v59, %v982_v19 }
  0xfe   : > { %1487 = vst [vmem:[%s1971_s15] sm:$0xff] %v1486_v22   ;;  %1570 = vst [vmem:[%s1971_s15 + $0x40] sm:$0xff] %v1526_v23   ;;  %v967_v30 = vmul.f32 %v1605_v24, %v1952_v51  ;;  %v983_v31 = vmul.f32 %v1653_v25, %v1952_v51 }
  0xff   : > { %v1607_v32 = vpop.f32.mrf.mxu0  ;;  %v1655_v33 = vpop.f32.mrf.mxu1  ;;  %v1037_v42 = vmax.f32 %v1005_v28, 0.0  ;;  %v1053_v43 = vmax.f32 %v1021_v29, 0.0 }
 0x100   : > { %v1608_v34 = vadd.f32 %v1607_v32, %v1606_v26  ;;  %v1656_v35 = vadd.f32 %v1655_v33, %v1654_v27  ;;  %v1006_v36 = vadd.f32 %v1959_v59, %v967_v30  ;;  %v1022_v37 = vadd.f32 %v1959_v59, %v983_v31 }
 0x101   : > { %v1609_v38 = vpop.f32.mrf.mxu0  ;;  %v1657_v39 = vpop.f32.mrf.mxu1 }
 0x102   : > { %v968_v40 = vmul.f32 %v1608_v34, %v1952_v51  ;;  %v984_v41 = vmul.f32 %v1656_v35, %v1952_v51  ;;  %v1038_v44 = vmax.f32 %v1006_v36, 0.0  ;;  %v1054_v45 = vmax.f32 %v1022_v37, 0.0 }
 0x103   : > { %v1610_v46 = vpop.f32.mrf.mxu0  ;;  %v1658_v47 = vpop.f32.mrf.mxu1 }
 0x104   : > { %v1611_v48 = vadd.f32 %v1610_v46, %v1609_v38  ;;  %v1659_v49 = vadd.f32 %v1658_v47, %v1657_v39  ;;  %v1491_v50 = vpack.c.bf16 %v1038_v44, %v1037_v42  ;;  %v1531_v52 = vpack.c.bf16 %v1054_v45, %v1053_v43 }
 0x105   : > { %v1612_v53 = vpop.f32.mrf.mxu0  ;;  %v1660_v54 = vpop.f32.mrf.mxu1  ;;  %v1007_v55 = vadd.f32 %v1959_v59, %v968_v40  ;;  %v1023_v56 = vadd.f32 %v1959_v59, %v984_v41 }
 0x106   : > { %v969_v57 = vmul.f32 %v1611_v48, %v1952_v51  ;;  %v985_v58 = vmul.f32 %v1659_v49, %v1952_v51  ;;  %1563 = vst [vmem:[%s1971_s15 + $0x8] sm:$0xff] %v1491_v50   ;;  %1571 = vst [vmem:[%s1971_s15 + $0x48] sm:$0xff] %v1531_v52  }
 0x107   : > { %v1613_v60 = vpop.f32.mrf.mxu0  ;;  %v1661_v61 = vpop.f32.mrf.mxu1  ;;  %v1039_v4 = vmax.f32 %v1007_v55, 0.0  ;;  %v1055_v5 = vmax.f32 %v1023_v56, 0.0 }
 0x108   : > { %v1008_v62 = vadd.f32 %v1959_v59, %v969_v57  ;;  %v1024_v63 = vadd.f32 %v1959_v59, %v985_v58  ;;  %v1614_v0 = vadd.f32 %v1613_v60, %v1612_v53  ;;  %v1662_v1 = vadd.f32 %v1661_v61, %v1660_v54 }
 0x109   : > { %v1615_v2 = vpop.f32.mrf.mxu0  ;;  %v1663_v3 = vpop.f32.mrf.mxu1 }
 0x10a   : > { %v1040_v6 = vmax.f32 %v1008_v62, 0.0  ;;  %v1056_v7 = vmax.f32 %v1024_v63, 0.0  ;;  %v970_v8 = vmul.f32 %v1614_v0, %v1952_v51  ;;  %v986_v9 = vmul.f32 %v1662_v1, %v1952_v51 }
 0x10b   : > { %v1616_v10 = vpop.f32.mrf.mxu0  ;;  %v1664_v11 = vpop.f32.mrf.mxu1 }
 0x10c   : > { %v1496_v12 = vpack.c.bf16 %v1040_v6, %v1039_v4  ;;  %v1536_v13 = vpack.c.bf16 %v1056_v7, %v1055_v5  ;;  %v1617_v14 = vadd.f32 %v1616_v10, %v1615_v2  ;;  %v1665_v15 = vadd.f32 %v1664_v11, %v1663_v3 }
 0x10d   : > { %v1618_v16 = vpop.f32.mrf.mxu0  ;;  %v1666_v17 = vpop.f32.mrf.mxu1  ;;  %v1009_v18 = vadd.f32 %v1959_v59, %v970_v8  ;;  %v1025_v19 = vadd.f32 %v1959_v59, %v986_v9 }
 0x10e   : > { %1564 = vst [vmem:[%s1971_s15 + $0x10] sm:$0xff] %v1496_v12   ;;  %1572 = vst [vmem:[%s1971_s15 + $0x50] sm:$0xff] %v1536_v13   ;;  %v971_v20 = vmul.f32 %v1617_v14, %v1952_v51  ;;  %v987_v21 = vmul.f32 %v1665_v15, %v1952_v51 }
 0x10f   : > { %v1619_v22 = vpop.f32.mrf.mxu0  ;;  %v1667_v23 = vpop.f32.mrf.mxu1  ;;  %v1041_v32 = vmax.f32 %v1009_v18, 0.0  ;;  %v1057_v33 = vmax.f32 %v1025_v19, 0.0 }
 0x110   : > { %v1620_v24 = vadd.f32 %v1619_v22, %v1618_v16  ;;  %v1668_v25 = vadd.f32 %v1667_v23, %v1666_v17  ;;  %v1010_v26 = vadd.f32 %v1959_v59, %v971_v20  ;;  %v1026_v27 = vadd.f32 %v1959_v59, %v987_v21 }
 0x111   : > { %v1621_v28 = vpop.f32.mrf.mxu0  ;;  %v1669_v29 = vpop.f32.mrf.mxu1 }
 0x112   : > { %v972_v30 = vmul.f32 %v1620_v24, %v1952_v51  ;;  %v988_v31 = vmul.f32 %v1668_v25, %v1952_v51  ;;  %v1042_v34 = vmax.f32 %v1010_v26, 0.0  ;;  %v1058_v35 = vmax.f32 %v1026_v27, 0.0 }
 0x113   : > { %v1622_v36 = vpop.f32.mrf.mxu0  ;;  %v1670_v37 = vpop.f32.mrf.mxu1 }
 0x114   : > { %v1623_v38 = vadd.f32 %v1622_v36, %v1621_v28  ;;  %v1671_v39 = vadd.f32 %v1670_v37, %v1669_v29  ;;  %v1501_v40 = vpack.c.bf16 %v1042_v34, %v1041_v32  ;;  %v1541_v41 = vpack.c.bf16 %v1058_v35, %v1057_v33 }
 0x115   : > { %v1624_v42 = vpop.f32.mrf.mxu0  ;;  %v1672_v43 = vpop.f32.mrf.mxu1  ;;  %v1011_v44 = vadd.f32 %v1959_v59, %v972_v30  ;;  %v1027_v45 = vadd.f32 %v1959_v59, %v988_v31 }
 0x116   : > { %v973_v46 = vmul.f32 %v1623_v38, %v1952_v51  ;;  %v989_v47 = vmul.f32 %v1671_v39, %v1952_v51  ;;  %1565 = vst [vmem:[%s1971_s15 + $0x18] sm:$0xff] %v1501_v40   ;;  %1573 = vst [vmem:[%s1971_s15 + $0x58] sm:$0xff] %v1541_v41  }
 0x117   : > { %v1625_v48 = vpop.f32.mrf.mxu0  ;;  %v1673_v49 = vpop.f32.mrf.mxu1  ;;  %v1043_v57 = vmax.f32 %v1011_v44, 0.0  ;;  %v1059_v58 = vmax.f32 %v1027_v45, 0.0 }
 0x118   : > { %v1012_v50 = vadd.f32 %v1959_v59, %v973_v46  ;;  %v1028_v52 = vadd.f32 %v1959_v59, %v989_v47  ;;  %v1626_v53 = vadd.f32 %v1625_v48, %v1624_v42  ;;  %v1674_v54 = vadd.f32 %v1673_v49, %v1672_v43 }
 0x119   : > { %v1627_v55 = vpop.f32.mrf.mxu0  ;;  %v1675_v56 = vpop.f32.mrf.mxu1 }
 0x11a   : > { %v1044_v60 = vmax.f32 %v1012_v50, 0.0  ;;  %v1060_v61 = vmax.f32 %v1028_v52, 0.0  ;;  %v974_v62 = vmul.f32 %v1626_v53, %v1952_v51  ;;  %v990_v63 = vmul.f32 %v1674_v54, %v1952_v51 }
 0x11b   : > { %v1628_v0 = vpop.f32.mrf.mxu0  ;;  %v1676_v1 = vpop.f32.mrf.mxu1 }
 0x11c   : > { %v1506_v2 = vpack.c.bf16 %v1044_v60, %v1043_v57  ;;  %v1546_v3 = vpack.c.bf16 %v1060_v61, %v1059_v58  ;;  %v1629_v4 = vadd.f32 %v1628_v0, %v1627_v55  ;;  %v1677_v5 = vadd.f32 %v1676_v1, %v1675_v56 }
 0x11d   : > { %v1630_v6 = vpop.f32.mrf.mxu0  ;;  %v1678_v7 = vpop.f32.mrf.mxu1  ;;  %v1013_v8 = vadd.f32 %v1959_v59, %v974_v62  ;;  %v1029_v9 = vadd.f32 %v1959_v59, %v990_v63 }
 0x11e   : > { %1566 = vst [vmem:[%s1971_s15 + $0x20] sm:$0xff] %v1506_v2   ;;  %1574 = vst [vmem:[%s1971_s15 + $0x60] sm:$0xff] %v1546_v3   ;;  %v975_v10 = vmul.f32 %v1629_v4, %v1952_v51  ;;  %v991_v11 = vmul.f32 %v1677_v5, %v1952_v51 }
 0x11f   : > { %v1631_v12 = vpop.f32.mrf.mxu0  ;;  %v1679_v13 = vpop.f32.mrf.mxu1  ;;  %v1045_v22 = vmax.f32 %v1013_v8, 0.0  ;;  %v1061_v23 = vmax.f32 %v1029_v9, 0.0 }
 0x120   : > { %v1632_v14 = vadd.f32 %v1631_v12, %v1630_v6  ;;  %v1680_v15 = vadd.f32 %v1679_v13, %v1678_v7  ;;  %v1014_v16 = vadd.f32 %v1959_v59, %v975_v10  ;;  %v1030_v17 = vadd.f32 %v1959_v59, %v991_v11 }
 0x121   : > { %v1633_v18 = vpop.f32.mrf.mxu0  ;;  %v1681_v19 = vpop.f32.mrf.mxu1 }
 0x122   : > { %v976_v20 = vmul.f32 %v1632_v14, %v1952_v51  ;;  %v992_v21 = vmul.f32 %v1680_v15, %v1952_v51  ;;  %v1046_v24 = vmax.f32 %v1014_v16, 0.0  ;;  %v1062_v25 = vmax.f32 %v1030_v17, 0.0 }
 0x123   : > { %v1634_v26 = vpop.f32.mrf.mxu0  ;;  %v1682_v27 = vpop.f32.mrf.mxu1 }
 0x124   : > { %v1635_v28 = vadd.f32 %v1634_v26, %v1633_v18  ;;  %v1683_v29 = vadd.f32 %v1682_v27, %v1681_v19  ;;  %v1511_v30 = vpack.c.bf16 %v1046_v24, %v1045_v22  ;;  %v1551_v31 = vpack.c.bf16 %v1062_v25, %v1061_v23 }
 0x125   : > { %v1636_v32 = vpop.f32.mrf.mxu0  ;;  %v1684_v33 = vpop.f32.mrf.mxu1  ;;  %v1015_v34 = vadd.f32 %v1959_v59, %v976_v20  ;;  %v1031_v35 = vadd.f32 %v1959_v59, %v992_v21 }
 0x126   : > { %v977_v36 = vmul.f32 %v1635_v28, %v1952_v51  ;;  %v993_v37 = vmul.f32 %v1683_v29, %v1952_v51  ;;  %1567 = vst [vmem:[%s1971_s15 + $0x28] sm:$0xff] %v1511_v30   ;;  %1575 = vst [vmem:[%s1971_s15 + $0x68] sm:$0xff] %v1551_v31  }
 0x127   : > { %v1637_v38 = vpop.f32.mrf.mxu0  ;;  %v1685_v39 = vpop.f32.mrf.mxu1  ;;  %v1047_v46 = vmax.f32 %v1015_v34, 0.0  ;;  %v1063_v47 = vmax.f32 %v1031_v35, 0.0 }
 0x128   : > { %v1016_v40 = vadd.f32 %v1959_v59, %v977_v36  ;;  %v1032_v41 = vadd.f32 %v1959_v59, %v993_v37  ;;  %v1638_v42 = vadd.f32 %v1637_v38, %v1636_v32  ;;  %v1686_v43 = vadd.f32 %v1685_v39, %v1684_v33 }
 0x129   : > { %v1639_v44 = vpop.f32.mrf.mxu0  ;;  %v1687_v45 = vpop.f32.mrf.mxu1 }
 0x12a   : > { %v1048_v48 = vmax.f32 %v1016_v40, 0.0  ;;  %v1064_v49 = vmax.f32 %v1032_v41, 0.0  ;;  %v978_v50 = vmul.f32 %v1638_v42, %v1952_v51  ;;  %v994_v52 = vmul.f32 %v1686_v43, %v1952_v51 }
 0x12b   : > { %v1640_v53 = vpop.f32.mrf.mxu0  ;;  %v1688_v54 = vpop.f32.mrf.mxu1 }
 0x12c   : > { %v1516_v55 = vpack.c.bf16 %v1048_v48, %v1047_v46  ;;  %v1556_v56 = vpack.c.bf16 %v1064_v49, %v1063_v47  ;;  %v1641_v57 = vadd.f32 %v1640_v53, %v1639_v44  ;;  %v1689_v58 = vadd.f32 %v1688_v54, %v1687_v45 }
 0x12d   : > { %v1017_v60 = vadd.f32 %v1959_v59, %v978_v50  ;;  %v1033_v61 = vadd.f32 %v1959_v59, %v994_v52 }
 0x12e   : > { %1568 = vst [vmem:[%s1971_s15 + $0x30] sm:$0xff] %v1516_v55   ;;  %1576 = vst [vmem:[%s1971_s15 + $0x70] sm:$0xff] %v1556_v56   ;;  %v979_v62 = vmul.f32 %v1641_v57, %v1952_v51  ;;  %v995_v63 = vmul.f32 %v1689_v58, %v1952_v51 }
 0x12f   : > { %v1049_v2 = vmax.f32 %v1017_v60, 0.0  ;;  %v1065_v3 = vmax.f32 %v1033_v61, 0.0 }
 0x130   : > { %v1018_v0 = vadd.f32 %v1959_v59, %v979_v62  ;;  %v1034_v1 = vadd.f32 %v1959_v59, %v995_v63 }
 0x132   : > { %v1050_v4 = vmax.f32 %v1018_v0, 0.0  ;;  %v1066_v5 = vmax.f32 %v1034_v1, 0.0 }
 0x134   : > { %v1521_v6 = vpack.c.bf16 %v1050_v4, %v1049_v2  ;;  %v1561_v7 = vpack.c.bf16 %v1066_v5, %v1065_v3 }
 0x136   : > { %1569 = vst [vmem:[%s1971_s15 + $0x38] sm:$0xff] %v1521_v6   ;;  %1577 = vst [vmem:[%s1971_s15 + $0x78] sm:$0xff] %v1561_v7  }
 0x137 PF: > { %s14_s17 = sadd.s32 1, %s1816_s17   ;;  %s2059_s15 = smov %s1812_s16 }
 0x138   : > { %p11_p5 = scmp.ge.s32.totalorder %s14_s17, 4   ;;  %s2060_s16 = smov %s2062_s18 }
 0x13a   :  { %13 = sbr.rel (!%p11_p5) target bundleno = 2 (0x2), region = 83 }

</bundles_post_ra>
